<compile_context>
chip_gen: v6e
topology: v6e:2x2x1
jax: 0.10.0
libtpu: 0.0.40
codegen_flags: <defaults>
</compile_context>

<pallas_src>
import jax
import jax.numpy as jnp
from jax.experimental import pallas as pl
from jax.experimental.pallas import tpu as pltpu


def _logreg_kernel(x_ref, w_ref, b_ref, o_ref):
    # x_ref: (TM, F), w_ref: (F, C), b_ref: (1, C), o_ref: (TM, C)
    logits = jnp.dot(x_ref[...], w_ref[...],
                     preferred_element_type=jnp.float32) + b_ref[...]

    # Numerically-stable log_softmax over the last axis, all in f32.
    m = jnp.max(logits, axis=-1, keepdims=True)
    shifted = logits - m
    lse = jnp.log(jnp.sum(jnp.exp(shifted), axis=-1, keepdims=True))
    o_ref[...] = (shifted - lse).astype(o_ref.dtype)


def _round_up(x, m):
    return ((x + m - 1) // m) * m


def _vmem_budget():
    """(tiling budget bytes, compiler vmem_limit bytes) per TPU generation."""
    cap = None
    try:
        cap = getattr(pltpu.get_tpu_info(), "vmem_capacity_bytes", None)
    except Exception:
        cap = None
    if cap is None or cap <= 64 * 1024 * 1024:
        # v7x-class (64 MiB physical) or unknown generation: stay conservative.
        return 24 * 1024 * 1024, 32 * 1024 * 1024
    # v5e / v6e: 128 MiB physical VMEM -> allow much larger row tiles.
    return 80 * 1024 * 1024, 96 * 1024 * 1024


def _choose_tm(n_rows, ft_in, n_classes, x_itemsize, w_itemsize, out_itemsize,
               vmem_budget_bytes):
    """Largest multiple-of-8 row tile that fits the VMEM budget."""
    # VMEM buffers are laid out in (8,128) tiles -> round minor dims up.
    f_lane = _round_up(ft_in, 128)
    c_lane = _round_up(n_classes, 128)
    # Resident operands: conservatively assume the pipeline keeps 2 buffers
    # for W and bias even though their index_map is constant (single DMA).
    resident = (2 * _round_up(ft_in, 8) * c_lane * w_itemsize
                + 2 * 8 * c_lane * 4)
    # Per-row streamed bytes: double-buffered x and out blocks plus ~3 f32
    # intermediates of width C (logits / shifted / exp) that may live in VMEM.
    per_row = (2 * f_lane * x_itemsize
               + 2 * c_lane * out_itemsize
               + 3 * c_lane * 4)
    avail = max(vmem_budget_bytes - resident, 8 * per_row)
    tm = max(8, (avail // per_row // 8) * 8)
    # Ensure >=2 grid steps for v7x's two TensorCores whenever halving still
    # leaves large (>=256-row) tiles; on v5e/v6e this is neutral.
    if n_rows >= 512:
        tm = min(tm, _round_up((n_rows + 1) // 2, 8))
    # Never exceed the (8-rounded) row count.
    tm = min(tm, _round_up(n_rows, 8))
    return tm


def logreg_forward(seq, weight_t, bias):
    """seq: (N, F), weight_t: (F, C), bias: (C,) -> (N, C) log-probabilities."""
    N, F = seq.shape
    C = weight_t.shape[1]
    out_dtype = seq.dtype

    budget, vmem_limit = _vmem_budget()
    TM = _choose_tm(
        N, F, C,
        jnp.dtype(seq.dtype).itemsize,
        jnp.dtype(weight_t.dtype).itemsize,
        jnp.dtype(out_dtype).itemsize,
        budget,
    )
    steps = pl.cdiv(N, TM)

    # Bias as a (1, C) f32 row so the add broadcasts over the row tile.
    b2d = bias.astype(jnp.float32).reshape(1, C)

    out = pl.pallas_call(
        _logreg_kernel,
        out_shape=jax.ShapeDtypeStruct((N, C), out_dtype),
        grid_spec=pltpu.PrefetchScalarGridSpec(
            num_scalar_prefetch=0,
            grid=(steps,),
            in_specs=[
                pl.BlockSpec((TM, F), lambda i: (i, 0)),   # streamed x tile
                pl.BlockSpec((F, C), lambda i: (0, 0)),    # resident W
                pl.BlockSpec((1, C), lambda i: (0, 0)),    # resident bias
            ],
            out_specs=pl.BlockSpec((TM, C), lambda i: (i, 0)),
        ),
        compiler_params=pltpu.CompilerParams(
            dimension_semantics=("parallel",),
            vmem_limit_bytes=vmem_limit,
        ),
        cost_estimate=pl.CostEstimate(
            flops=2 * N * F * C,
            transcendentals=N * (C + 1),
            bytes_accessed=(N * F * jnp.dtype(seq.dtype).itemsize
                            + F * C * jnp.dtype(weight_t.dtype).itemsize
                            + C * 4
                            + N * C * jnp.dtype(out_dtype).itemsize),
        ),
    )(seq, weight_t, b2d)

    return out


def init_logreg_params(key, ft_in, nb_classes):
    """Xavier-uniform weight (as in the PyTorch module), zero bias."""
    limit = jnp.sqrt(6.0 / (ft_in + nb_classes))
    # PyTorch weight shape is (nb_classes, ft_in); we store its transpose.
    w = jax.random.uniform(
        key, (nb_classes, ft_in), minval=-limit, maxval=limit, dtype=jnp.float32
    )
    weight_t = w.T  # (ft_in, nb_classes)
    bias = jnp.zeros((nb_classes,), dtype=jnp.float32)
    return weight_t, bias


if __name__ == "__main__":
    key = jax.random.PRNGKey(0)
    k_x, k_w = jax.random.split(key)

    # Small synthetic shapes; N=12 deliberately exercises the ragged last tile
    # (no external padding, no output slice).
    N, FT_IN, NB_CLASSES = 12, 32, 8
    seq = jax.random.normal(k_x, (N, FT_IN), dtype=jnp.float32)
    weight_t, bias = init_logreg_params(k_w, FT_IN, NB_CLASSES)

    out = logreg_forward(seq, weight_t, bias)
    out = jax.block_until_ready(out)

    # Reference check in plain JAX.
    ref = jax.nn.log_softmax(seq @ weight_t + bias, axis=-1)
    assert out.shape == (N, NB_CLASSES)
    assert jnp.allclose(out, ref, atol=1e-5, rtol=1e-5)

    print("KERNEL_OK")
</pallas_src>

<mosaic_0001>
module attributes {stable_mosaic.version = 11 : i64} {
  func.func @_logreg_kernel(%arg0: i32, %arg1: memref<16x32xf32, #tpu.memory_space<vmem>>, %arg2: memref<32x8xf32, #tpu.memory_space<vmem>>, %arg3: memref<1x8xf32, #tpu.memory_space<vmem>>, %arg4: memref<16x8xf32, #tpu.memory_space<vmem>>) attributes {dimension_semantics = [#tpu.dimension_semantics<parallel>], iteration_bounds = array<i64: 1>, scalar_prefetch = 0 : i64, scratch_operands = 0 : i64, tpu.core_type = #tpu.core_type<tc>, window_params = [{transform_indices = @transform_0, window_bounds = array<i64: 16, 32>}, {pipeline_mode = #tpu.pipeline_mode<synchronous>, transform_indices = @transform_1, window_bounds = array<i64: 32, 8>}, {pipeline_mode = #tpu.pipeline_mode<synchronous>, transform_indices = @transform_2, window_bounds = array<i64: 1, 8>}, {transform_indices = @transform_3, window_bounds = array<i64: 16, 8>}]} {
    %c0 = arith.constant 0 : index
    %c0_0 = arith.constant 0 : index
    %0 = vector.load %arg1[%c0, %c0_0] : memref<16x32xf32, #tpu.memory_space<vmem>>, vector<16x32xf32>
    %c0_1 = arith.constant 0 : index
    %c0_2 = arith.constant 0 : index
    %1 = vector.load %arg2[%c0_1, %c0_2] : memref<32x8xf32, #tpu.memory_space<vmem>>, vector<32x8xf32>
    %cst = arith.constant dense<0.000000e+00> : vector<16x8xf32>
    %2 = tpu.matmul %0, %1, %cst {dimension_numbers = #tpu.dot_dimension_numbers<[1], [0], [0], [1], [0, 0, 1, 1], [], []>} : vector<16x32xf32>, vector<32x8xf32>, vector<16x8xf32> -> vector<16x8xf32>
    %c0_3 = arith.constant 0 : index
    %c0_4 = arith.constant 0 : index
    %3 = vector.load %arg3[%c0_3, %c0_4] : memref<1x8xf32, #tpu.memory_space<vmem>>, vector<1x8xf32>
    %4 = vector.broadcast %3 : vector<1x8xf32> to vector<16x8xf32>
    %5 = arith.addf %2, %4 : vector<16x8xf32>
    %cst_5 = arith.constant dense<0xFF800000> : vector<16xf32>
    %6 = vector.multi_reduction <maximumf>, %5, %cst_5 [1] : vector<16x8xf32> to vector<16xf32>
    %7 = vector.shape_cast %6 : vector<16xf32> to vector<16x1xf32>
    %8 = vector.broadcast %7 : vector<16x1xf32> to vector<16x8xf32>
    %9 = arith.subf %5, %8 : vector<16x8xf32>
    %10 = math.exp %9 : vector<16x8xf32>
    %cst_6 = arith.constant dense<0.000000e+00> : vector<16xf32>
    %11 = vector.multi_reduction <add>, %10, %cst_6 [1] : vector<16x8xf32> to vector<16xf32>
    %12 = vector.shape_cast %11 : vector<16xf32> to vector<16x1xf32>
    %13 = math.log %12 : vector<16x1xf32>
    %14 = vector.broadcast %13 : vector<16x1xf32> to vector<16x8xf32>
    %15 = arith.subf %9, %14 : vector<16x8xf32>
    %c0_7 = arith.constant 0 : index
    %c0_8 = arith.constant 0 : index
    %16 = vector.load %arg4[%c0_7, %c0_8] : memref<16x8xf32, #tpu.memory_space<vmem>>, vector<16x8xf32>
    tpu.vector_store %arg4[%c0_7, %c0_8], %15 {strides = array<i32>} : memref<16x8xf32, #tpu.memory_space<vmem>>, vector<16x8xf32>,
    return
  }
  func.func @transform_0(%arg0: i32) -> (i32, i32) {
    %c0_i32 = arith.constant 0 : i32
    %c0_i32_0 = arith.constant 0 : i32
    return %arg0, %c0_i32 : i32, i32
  }
  func.func @transform_1(%arg0: i32) -> (i32, i32) {
    %c0_i32 = arith.constant 0 : i32
    %c0_i32_0 = arith.constant 0 : i32
    %c0_i32_1 = arith.constant 0 : i32
    return %c0_i32, %c0_i32_0 : i32, i32
  }
  func.func @transform_2(%arg0: i32) -> (i32, i32) {
    %c0_i32 = arith.constant 0 : i32
    %c0_i32_0 = arith.constant 0 : i32
    %c0_i32_1 = arith.constant 0 : i32
    return %c0_i32, %c0_i32_0 : i32, i32
  }
  func.func @transform_3(%arg0: i32) -> (i32, i32) {
    %c0_i32 = arith.constant 0 : i32
    %c0_i32_0 = arith.constant 0 : i32
    return %arg0, %c0_i32 : i32, i32
  }
}

</mosaic_0001>

<bundles_post_ra>
// kernel: tpu_custom_call.1
= control target key start
LH: loop header
LB: loop body
LE: loop exit
PB: predicated region body
PF: predicated region fallthrough
CT: control target
= control target key end

     0   :  { %vm27_vm0 = vcmask 261120   ;;  %vm109_vm1 = vcmask 64512   ;;  %s223_s1 = inlined_call_operand.vmem [shape: f32[32,8], index: 1, kind: input, shape index: {}]   ;;  %s224_s0 = inlined_call_operand.vmem [shape: f32[12,32], index: 0, kind: input, shape index: {}]   ;;  %s225_s2 = inlined_call_operand.vmem [shape: f32[1,8], index: 2, kind: input, shape index: {}]   ;;  %s226_s3 = inlined_call_operand.vmem [shape: f32[12,8], index: 3, kind: output, shape index: {}]  }
   0x1   :  { %v19_v0 = vld [vmem:[%s223_s1 + $0x18] sm:$0xff]  ;;  %v18_v1 = vld [vmem:[%s223_s1 + $0x10] sm:$0xff]  ;;  %v14_v2 = vld [vmem:[%s224_s0] sm:$0xff] }
   0x2   :  { %149 = vmatprep.subr.mxu0 %v19_v0  ;;  %v17_v3 = vld [vmem:[%s223_s1 + $0x8] sm:$0xff]  ;;  %157 = vmatprep.mubr.msk.f32.mxu0 %vm27_vm0, %v14_v2  ;;  %v16_v4 = vld [vmem:[%s223_s1] sm:$0xff] }
   0x3   :  { %150 = vmatpush3.msra.mxu0 %v19_v0  ;;  %v15_v5 = vld [vmem:[%s224_s0 + $0x8] sm:$0xff]  ;;  %v140_v7 = vld [vmem:[%s225_s2] ss:$0 sm:$0xff] }
   0x4   :  { %151 = vmatprep.subr.mxu0 %v18_v1 }
   0x5   :  { %152 = vmatpush3.msra.mxu0 %v18_v1 }
   0x6   :  { %153 = vmatprep.subr.mxu0 %v17_v3 }
   0x7   :  { %154 = vmatpush3.msra.mxu0 %v17_v3 }
   0x8   :  { %155 = vmatprep.subr.mxu0 %v16_v4 }
   0x9   :  { %156 = vmatpush3.msra.mxu0 %v16_v4 }
   0xa   :  { %158 = vmatmul.mubr.msk.f32.vlgmr.msra.gmra.mxu0 %vm27_vm0, %v15_v5 }
  0xca   :  { %v159_v6 = vpop.f32.mrf.mxu0 }
  0xcb   :  { %v106_v10 = vadd.f32 %v159_v6, %v140_v7 }
  0xcc   :  { %v100_v8 = vpop.f32.mrf.mxu0 }
  0xcd   :  { %v101_v9 = vadd.f32 %v140_v7, %v100_v8  ;;  %v113_v12 = vsel %vm109_vm1, %v106_v10, -inf }
  0xcf   :  { %v110_v11 = vsel %vm109_vm1, %v101_v9, -inf }
  0xd0   :  { %111 = vmax.xlane.f32.xlu0 %v110_v11 }
  0xd4   :  { %114 = vmax.xlane.f32.xlu0 %v113_v12 }
 0x159   :  { %v112_v13 = vpop.xlane.xlu0 %111 }
 0x15a   :  { %v116_v14 = vsub.f32 %v101_v9, %v112_v13 }
 0x15c   :  { %v118_v15 = vmul.f32 1.442695, %v116_v14 }
 0x15d   :  { %v115_v16 = vpop.xlane.xlu0 %114 }
 0x15e   :  { %160 = vpow2.f32 %v118_v15  ;;  %v117_v17 = vsub.f32 %v106_v10, %v115_v16 }
 0x160   :  { %v120_v18 = vmul.f32 1.442695, %v117_v17 }
 0x162   :  { %162 = vpow2.f32 %v120_v18 }
 0x16b   :  { %v161_v19 = vpop.eup %160 }
 0x16c   :  { %v122_v20 = vsel %vm109_vm1, %v161_v19, 0.0 }
 0x16d   :  { %123 = vadd.xlane.f32.xlu1 %v122_v20 }
 0x16f   :  { %v163_v21 = vpop.eup %162 }
 0x170   :  { %v125_v22 = vsel %vm109_vm1, %v163_v21, 0.0 }
 0x171   :  { %126 = vadd.xlane.f32.xlu1 %v125_v22 }
 0x1f6   :  { %v124_v23 = vpop.xlane.xlu1 %123 }
 0x1f7   :  { %164 = vlog2.f32 %v124_v23 }
 0x1fa   :  { %v127_v24 = vpop.xlane.xlu1 %126 }
 0x1fb   :  { %166 = vlog2.f32 %v127_v24 }
 0x204   :  { %v165_v25 = vpop.eup %164 }
 0x205   :  { %v129_v26 = vmul.f32 0.6931472, %v165_v25 }
 0x207   :  { %v132_v27 = vsub.f32 %v116_v14, %v129_v26 }
 0x208   :  { %v167_v28 = vpop.eup %166 }
 0x209   :  { %134 = vst.msk [vmem:[%s226_s3] sm:$0xff] %vm109_vm1, %v132_v27  ;;  %v131_v29 = vmul.f32 0.6931472, %v167_v28 }
 0x20b   :  { %v133_v30 = vsub.f32 %v117_v17, %v131_v29 }
 0x20d   :  { %135 = vst.msk [vmem:[%s226_s3 + $0x8] sm:$0xff] %vm109_vm1, %v133_v30 }

</bundles_post_ra>
